<compile_context>
chip_gen: v7x
topology: tpu7x:2x2x1
jax: 0.10.0
libtpu: 0.0.40
codegen_flags: <defaults>
</compile_context>

<pallas_src>
import math
import functools

import numpy as np
import jax
import jax.numpy as jnp
from jax.experimental import pallas as pl
from jax.experimental.pallas import tpu as pltpu

ALPHA = 0.8          # CombinedLoss alpha
WINDOW = 11          # ssim window size
SIGMA = 1.5          # kornia gaussian sigma
MAX_VAL = 1.0
C1 = (0.01 * MAX_VAL) ** 2
C2 = (0.03 * MAX_VAL) ** 2
SSIM_EPS = 1e-12     # kornia ssim eps
RMSE_EPS = 1e-6      # RMSELoss eps
PAD = WINDOW // 2


def _gaussian_weights():
    # kornia get_gaussian_kernel1d(11, 1.5), normalized to sum 1.
    xs = [float(i - WINDOW // 2) for i in range(WINDOW)]
    g = [math.exp(-(v * v) / (2.0 * SIGMA * SIGMA)) for v in xs]
    s = sum(g)
    return [v / s for v in g]


_GW = _gaussian_weights()


def _reflect(p, n):
    # 'reflect' (edge not repeated) — matches kornia filter2d border 'reflect'.
    if p < 0:
        p = -p
    if p >= n:
        p = 2 * (n - 1) - p
    return p


def _band_matrix(n):
    """(n, n) matrix M with (M @ v)[i] == reflect-padded 11-tap gaussian of v at i."""
    m = np.zeros((n, n), np.float32)
    for i in range(n):
        for k in range(WINDOW):
            m[i, _reflect(i - PAD + k, n)] += _GW[k]
    return m


def _combined_loss_kernel(a_ref, bt_ref, x_ref, y_ref, o_ref, acc_ref, *, n_total):
    """Grid: one step per (batch, channel) plane. Accumulates two scalars."""
    p = pl.program_id(0)

    @pl.when(p == 0)
    def _init():
        acc_ref[0] = 0.0
        acc_ref[1] = 0.0

    # Native-dtype DMA; all math in f32 inside the kernel.
    x = x_ref[0].astype(jnp.float32)      # (H, W)
    y = y_ref[0].astype(jnp.float32)      # (H, W)
    A = a_ref[...]                        # (H, H) row (sublane) gaussian band
    Bt = bt_ref[...]                      # (W, W) column (lane) gaussian band^T

    def filt(img):
        # Separable reflect-padded gaussian as two MXU matmuls.
        t = jnp.dot(A, img, preferred_element_type=jnp.float32)
        return jnp.dot(t, Bt, preferred_element_type=jnp.float32)

    # ---- RMSE partial: sum of squared differences for this plane ----
    diff = x - y
    acc_ref[0] = acc_ref[0] + jnp.sum(diff * diff)

    # ---- SSIM partial (kornia.losses.ssim_loss, window=11, sigma=1.5) ----
    mu1 = filt(x)
    mu2 = filt(y)
    mu1_sq = mu1 * mu1
    mu2_sq = mu2 * mu2
    mu1_mu2 = mu1 * mu2
    sigma1_sq = filt(x * x) - mu1_sq
    sigma2_sq = filt(y * y) - mu2_sq
    sigma12 = filt(x * y) - mu1_mu2

    num = (2.0 * mu1_mu2 + C1) * (2.0 * sigma12 + C2)
    den = (mu1_sq + mu2_sq + C1) * (sigma1_sq + sigma2_sq + C2)
    ssim_map = num * pl.reciprocal(den + SSIM_EPS, approx=False)
    acc_ref[1] = acc_ref[1] + jnp.sum((1.0 - ssim_map) * 0.5)

    # ---- epilogue: finish the reduction on the last plane ----
    @pl.when(p == pl.num_programs(0) - 1)
    def _finalize():
        mse = acc_ref[0] / n_total
        rmse = jnp.sqrt(mse + RMSE_EPS)
        ssim_loss = acc_ref[1] / n_total
        o_ref[0] = ALPHA * rmse + (1.0 - ALPHA) * ssim_loss


def combined_loss(x, y):
    assert x.shape == y.shape and x.ndim == 4, "expected NCHW inputs"
    B, C, H, W = x.shape
    P = B * C

    # Keep native dtype through the DMA (cast to f32 inside the kernel).
    xr = x.reshape(P, H, W)
    yr = y.reshape(P, H, W)

    # Reflect padding + separable gaussian folded into banded matrices (MXU).
    A = jnp.asarray(_band_matrix(H))        # (H, H)
    Bt = jnp.asarray(_band_matrix(W).T)     # (W, W)

    itemsize = jnp.dtype(x.dtype).itemsize
    plane_f32 = H * W * 4
    vmem_est = (2 * 2 * H * W * itemsize    # x/y blocks, double-buffered
                + (H * H + W * W) * 4       # band matrices (resident)
                + 14 * plane_f32)           # live f32 temporaries (headroom)
    vmem_limit = int(min(max(2 * vmem_est, 16 << 20), 32 << 20))

    flops = P * (10 * H * W * (H + W) + 40 * H * W)
    bytes_accessed = 2 * P * H * W * itemsize + (H * H + W * W) * 4

    kernel = functools.partial(_combined_loss_kernel, n_total=float(P * H * W))
    out = pl.pallas_call(
        kernel,
        out_shape=jax.ShapeDtypeStruct((1,), jnp.float32),
        grid=(P,),
        in_specs=[
            pl.BlockSpec((H, H), lambda p: (0, 0)),      # A, resident
            pl.BlockSpec((W, W), lambda p: (0, 0)),      # Bt, resident
            pl.BlockSpec((1, H, W), lambda p: (p, 0, 0)),  # x plane
            pl.BlockSpec((1, H, W), lambda p: (p, 0, 0)),  # y plane
        ],
        out_specs=pl.BlockSpec(memory_space=pltpu.MemorySpace.SMEM),
        scratch_shapes=[pltpu.SMEM((2,), jnp.float32)],
        compiler_params=pltpu.CompilerParams(
            dimension_semantics=("arbitrary",),   # reduction over planes
            vmem_limit_bytes=vmem_limit,
        ),
        cost_estimate=pl.CostEstimate(
            flops=flops,
            transcendentals=P * H * W + 1,
            bytes_accessed=bytes_accessed,
        ),
    )(A, Bt, xr, yr)
    return out[0]


if __name__ == "__main__":
    key = jax.random.PRNGKey(0)
    kx, ky = jax.random.split(key)
    x = jax.random.uniform(kx, (2, 4, 16, 16), dtype=jnp.float32)
    y = jax.random.uniform(ky, (2, 4, 16, 16), dtype=jnp.float32)

    loss = combined_loss(x, y)
    jax.block_until_ready(loss)
    print("KERNEL_OK")
</pallas_src>

<mosaic_0001>
module attributes {stable_mosaic.version = 11 : i64} {
  func.func @_combined_loss_kernel(%arg0: i32, %arg1: memref<16x16xf32, #tpu.memory_space<vmem>>, %arg2: memref<16x16xf32, #tpu.memory_space<vmem>>, %arg3: memref<1x16x16xf32, #tpu.memory_space<vmem>>, %arg4: memref<1x16x16xf32, #tpu.memory_space<vmem>>, %arg5: memref<1xf32, #tpu.memory_space<smem>>, %arg6: memref<2xf32, #tpu.memory_space<smem>>) attributes {dimension_semantics = [#tpu.dimension_semantics<arbitrary>], iteration_bounds = array<i64: 8>, scalar_prefetch = 0 : i64, scratch_operands = 1 : i64, tpu.core_type = #tpu.core_type<tc>, window_params = [{pipeline_mode = #tpu.pipeline_mode<synchronous>, transform_indices = @transform_0, window_bounds = array<i64: 16, 16>}, {pipeline_mode = #tpu.pipeline_mode<synchronous>, transform_indices = @transform_1, window_bounds = array<i64: 16, 16>}, {transform_indices = @transform_2, window_bounds = array<i64: 1, 16, 16>}, {transform_indices = @transform_3, window_bounds = array<i64: 1, 16, 16>}, {transform_indices = @transform_4, window_bounds = array<i64: 1>}]} {
    %c0_i32 = arith.constant 0 : i32
    %0 = arith.cmpi eq, %arg0, %c0_i32 : i32
    %1 = arith.extui %0 : i1 to i32
    %c0_i32_0 = arith.constant 0 : i32
    %2 = arith.cmpi ne, %1, %c0_i32_0 : i32
    scf.if %2 {
      %cst_34 = arith.constant 0.000000e+00 : f32
      %c0_35 = arith.constant 0 : index
      %71 = memref.load %arg6[%c0_35] : memref<2xf32, #tpu.memory_space<smem>>
      memref.store %cst_34, %arg6[%c0_35] : memref<2xf32, #tpu.memory_space<smem>>
      %cst_36 = arith.constant 0.000000e+00 : f32
      %c1_37 = arith.constant 1 : index
      %72 = memref.load %arg6[%c1_37] : memref<2xf32, #tpu.memory_space<smem>>
      memref.store %cst_36, %arg6[%c1_37] : memref<2xf32, #tpu.memory_space<smem>>
    } else {
    }
    %c0 = arith.constant 0 : index
    %c0_1 = arith.constant 0 : index
    %c0_2 = arith.constant 0 : index
    %3 = vector.load %arg3[%c0, %c0_1, %c0_2] : memref<1x16x16xf32, #tpu.memory_space<vmem>>, vector<1x16x16xf32>
    %4 = vector.shape_cast %3 : vector<1x16x16xf32> to vector<16x16xf32>
    %c0_3 = arith.constant 0 : index
    %c0_4 = arith.constant 0 : index
    %c0_5 = arith.constant 0 : index
    %5 = vector.load %arg4[%c0_3, %c0_4, %c0_5] : memref<1x16x16xf32, #tpu.memory_space<vmem>>, vector<1x16x16xf32>
    %6 = vector.shape_cast %5 : vector<1x16x16xf32> to vector<16x16xf32>
    %c0_6 = arith.constant 0 : index
    %c0_7 = arith.constant 0 : index
    %7 = vector.load %arg1[%c0_6, %c0_7] : memref<16x16xf32, #tpu.memory_space<vmem>>, vector<16x16xf32>
    %c0_8 = arith.constant 0 : index
    %c0_9 = arith.constant 0 : index
    %8 = vector.load %arg2[%c0_8, %c0_9] : memref<16x16xf32, #tpu.memory_space<vmem>>, vector<16x16xf32>
    %9 = arith.subf %4, %6 : vector<16x16xf32>
    %c0_10 = arith.constant 0 : index
    %10 = memref.load %arg6[%c0_10] : memref<2xf32, #tpu.memory_space<smem>>
    %11 = arith.mulf %9, %9 : vector<16x16xf32>
    %12 = vector.shape_cast %11 : vector<16x16xf32> to vector<1x16x16xf32>
    %cst = arith.constant dense<0.000000e+00> : vector<1xf32>
    %13 = vector.multi_reduction <add>, %12, %cst [1, 2] : vector<1x16x16xf32> to vector<1xf32>
    %14 = vector.shape_cast %13 : vector<1xf32> to vector<1x1x1xf32>
    %15 = vector.extract %14[0, 0, 0] : f32 from vector<1x1x1xf32>
    %16 = arith.addf %10, %15 : f32
    %c0_11 = arith.constant 0 : index
    %17 = memref.load %arg6[%c0_11] : memref<2xf32, #tpu.memory_space<smem>>
    memref.store %16, %arg6[%c0_11] : memref<2xf32, #tpu.memory_space<smem>>
    %cst_12 = arith.constant dense<0.000000e+00> : vector<16x16xf32>
    %18 = tpu.matmul %7, %4, %cst_12 {dimension_numbers = #tpu.dot_dimension_numbers<[1], [0], [0], [1], [0, 0, 1, 1], [], []>} : vector<16x16xf32>, vector<16x16xf32>, vector<16x16xf32> -> vector<16x16xf32>
    %cst_13 = arith.constant dense<0.000000e+00> : vector<16x16xf32>
    %19 = tpu.matmul %18, %8, %cst_13 {dimension_numbers = #tpu.dot_dimension_numbers<[1], [0], [0], [1], [0, 0, 1, 1], [], []>} : vector<16x16xf32>, vector<16x16xf32>, vector<16x16xf32> -> vector<16x16xf32>
    %cst_14 = arith.constant dense<0.000000e+00> : vector<16x16xf32>
    %20 = tpu.matmul %7, %6, %cst_14 {dimension_numbers = #tpu.dot_dimension_numbers<[1], [0], [0], [1], [0, 0, 1, 1], [], []>} : vector<16x16xf32>, vector<16x16xf32>, vector<16x16xf32> -> vector<16x16xf32>
    %cst_15 = arith.constant dense<0.000000e+00> : vector<16x16xf32>
    %21 = tpu.matmul %20, %8, %cst_15 {dimension_numbers = #tpu.dot_dimension_numbers<[1], [0], [0], [1], [0, 0, 1, 1], [], []>} : vector<16x16xf32>, vector<16x16xf32>, vector<16x16xf32> -> vector<16x16xf32>
    %22 = arith.mulf %19, %19 : vector<16x16xf32>
    %23 = arith.mulf %21, %21 : vector<16x16xf32>
    %24 = arith.mulf %19, %21 : vector<16x16xf32>
    %25 = arith.mulf %4, %4 : vector<16x16xf32>
    %cst_16 = arith.constant dense<0.000000e+00> : vector<16x16xf32>
    %26 = tpu.matmul %7, %25, %cst_16 {dimension_numbers = #tpu.dot_dimension_numbers<[1], [0], [0], [1], [0, 0, 1, 1], [], []>} : vector<16x16xf32>, vector<16x16xf32>, vector<16x16xf32> -> vector<16x16xf32>
    %cst_17 = arith.constant dense<0.000000e+00> : vector<16x16xf32>
    %27 = tpu.matmul %26, %8, %cst_17 {dimension_numbers = #tpu.dot_dimension_numbers<[1], [0], [0], [1], [0, 0, 1, 1], [], []>} : vector<16x16xf32>, vector<16x16xf32>, vector<16x16xf32> -> vector<16x16xf32>
    %28 = arith.subf %27, %22 : vector<16x16xf32>
    %29 = arith.mulf %6, %6 : vector<16x16xf32>
    %cst_18 = arith.constant dense<0.000000e+00> : vector<16x16xf32>
    %30 = tpu.matmul %7, %29, %cst_18 {dimension_numbers = #tpu.dot_dimension_numbers<[1], [0], [0], [1], [0, 0, 1, 1], [], []>} : vector<16x16xf32>, vector<16x16xf32>, vector<16x16xf32> -> vector<16x16xf32>
    %cst_19 = arith.constant dense<0.000000e+00> : vector<16x16xf32>
    %31 = tpu.matmul %30, %8, %cst_19 {dimension_numbers = #tpu.dot_dimension_numbers<[1], [0], [0], [1], [0, 0, 1, 1], [], []>} : vector<16x16xf32>, vector<16x16xf32>, vector<16x16xf32> -> vector<16x16xf32>
    %32 = arith.subf %31, %23 : vector<16x16xf32>
    %33 = arith.mulf %4, %6 : vector<16x16xf32>
    %cst_20 = arith.constant dense<0.000000e+00> : vector<16x16xf32>
    %34 = tpu.matmul %7, %33, %cst_20 {dimension_numbers = #tpu.dot_dimension_numbers<[1], [0], [0], [1], [0, 0, 1, 1], [], []>} : vector<16x16xf32>, vector<16x16xf32>, vector<16x16xf32> -> vector<16x16xf32>
    %cst_21 = arith.constant dense<0.000000e+00> : vector<16x16xf32>
    %35 = tpu.matmul %34, %8, %cst_21 {dimension_numbers = #tpu.dot_dimension_numbers<[1], [0], [0], [1], [0, 0, 1, 1], [], []>} : vector<16x16xf32>, vector<16x16xf32>, vector<16x16xf32> -> vector<16x16xf32>
    %36 = arith.subf %35, %24 : vector<16x16xf32>
    %cst_22 = arith.constant 2.000000e+00 : f32
    %37 = vector.broadcast %cst_22 : f32 to vector<16x16xf32>
    %38 = arith.mulf %37, %24 : vector<16x16xf32>
    %cst_23 = arith.constant 9.99999974E-5 : f32
    %39 = vector.broadcast %cst_23 : f32 to vector<16x16xf32>
    %40 = arith.addf %38, %39 : vector<16x16xf32>
    %cst_24 = arith.constant 2.000000e+00 : f32
    %41 = vector.broadcast %cst_24 : f32 to vector<16x16xf32>
    %42 = arith.mulf %41, %36 : vector<16x16xf32>
    %cst_25 = arith.constant 8.99999984E-4 : f32
    %43 = vector.broadcast %cst_25 : f32 to vector<16x16xf32>
    %44 = arith.addf %42, %43 : vector<16x16xf32>
    %45 = arith.mulf %40, %44 : vector<16x16xf32>
    %46 = arith.addf %22, %23 : vector<16x16xf32>
    %cst_26 = arith.constant 9.99999974E-5 : f32
    %47 = vector.broadcast %cst_26 : f32 to vector<16x16xf32>
    %48 = arith.addf %46, %47 : vector<16x16xf32>
    %49 = arith.addf %28, %32 : vector<16x16xf32>
    %cst_27 = arith.constant 8.99999984E-4 : f32
    %50 = vector.broadcast %cst_27 : f32 to vector<16x16xf32>
    %51 = arith.addf %49, %50 : vector<16x16xf32>
    %52 = arith.mulf %48, %51 : vector<16x16xf32>
    %cst_28 = arith.constant 9.99999996E-13 : f32
    %53 = vector.broadcast %cst_28 : f32 to vector<16x16xf32>
    %54 = arith.addf %52, %53 : vector<16x16xf32>
    %55 = tpu.reciprocal %54 : vector<16x16xf32> -> vector<16x16xf32>
    %56 = arith.mulf %45, %55 : vector<16x16xf32>
    %c1 = arith.constant 1 : index
    %57 = memref.load %arg6[%c1] : memref<2xf32, #tpu.memory_space<smem>>
    %cst_29 = arith.constant 1.000000e+00 : f32
    %58 = vector.broadcast %cst_29 : f32 to vector<16x16xf32>
    %59 = arith.subf %58, %56 : vector<16x16xf32>
    %cst_30 = arith.constant 5.000000e-01 : f32
    %60 = vector.broadcast %cst_30 : f32 to vector<16x16xf32>
    %61 = arith.mulf %59, %60 : vector<16x16xf32>
    %62 = vector.shape_cast %61 : vector<16x16xf32> to vector<1x16x16xf32>
    %cst_31 = arith.constant dense<0.000000e+00> : vector<1xf32>
    %63 = vector.multi_reduction <add>, %62, %cst_31 [1, 2] : vector<1x16x16xf32> to vector<1xf32>
    %64 = vector.shape_cast %63 : vector<1xf32> to vector<1x1x1xf32>
    %65 = vector.extract %64[0, 0, 0] : f32 from vector<1x1x1xf32>
    %66 = arith.addf %57, %65 : f32
    %c1_32 = arith.constant 1 : index
    %67 = memref.load %arg6[%c1_32] : memref<2xf32, #tpu.memory_space<smem>>
    memref.store %66, %arg6[%c1_32] : memref<2xf32, #tpu.memory_space<smem>>
    %c7_i32 = arith.constant 7 : i32
    %68 = arith.cmpi eq, %arg0, %c7_i32 : i32
    %69 = arith.extui %68 : i1 to i32
    %c0_i32_33 = arith.constant 0 : i32
    %70 = arith.cmpi ne, %69, %c0_i32_33 : i32
    scf.if %70 {
      %c0_34 = arith.constant 0 : index
      %71 = memref.load %arg6[%c0_34] : memref<2xf32, #tpu.memory_space<smem>>
      %cst_35 = arith.constant 2.048000e+03 : f32
      %72 = arith.divf %71, %cst_35 : f32
      %cst_36 = arith.constant 9.99999997E-7 : f32
      %73 = arith.addf %72, %cst_36 : f32
      %74 = math.sqrt %73 : f32
      %c1_37 = arith.constant 1 : index
      %75 = memref.load %arg6[%c1_37] : memref<2xf32, #tpu.memory_space<smem>>
      %cst_38 = arith.constant 2.048000e+03 : f32
      %76 = arith.divf %75, %cst_38 : f32
      %cst_39 = arith.constant 8.000000e-01 : f32
      %77 = arith.mulf %cst_39, %74 : f32
      %cst_40 = arith.constant 2.000000e-01 : f32
      %78 = arith.mulf %cst_40, %76 : f32
      %79 = arith.addf %77, %78 : f32
      %c0_41 = arith.constant 0 : index
      %80 = memref.load %arg5[%c0_41] : memref<1xf32, #tpu.memory_space<smem>>
      memref.store %79, %arg5[%c0_41] : memref<1xf32, #tpu.memory_space<smem>>
    } else {
    }
    return
  }
  func.func @transform_0(%arg0: i32) -> (i32, i32) {
    %c0_i32 = arith.constant 0 : i32
    %c0_i32_0 = arith.constant 0 : i32
    %c0_i32_1 = arith.constant 0 : i32
    return %c0_i32, %c0_i32_0 : i32, i32
  }
  func.func @transform_1(%arg0: i32) -> (i32, i32) {
    %c0_i32 = arith.constant 0 : i32
    %c0_i32_0 = arith.constant 0 : i32
    %c0_i32_1 = arith.constant 0 : i32
    return %c0_i32, %c0_i32_0 : i32, i32
  }
  func.func @transform_2(%arg0: i32) -> (i32, i32, i32) {
    %c0_i32 = arith.constant 0 : i32
    %c0_i32_0 = arith.constant 0 : i32
    %c0_i32_1 = arith.constant 0 : i32
    return %arg0, %c0_i32, %c0_i32_0 : i32, i32, i32
  }
  func.func @transform_3(%arg0: i32) -> (i32, i32, i32) {
    %c0_i32 = arith.constant 0 : i32
    %c0_i32_0 = arith.constant 0 : i32
    %c0_i32_1 = arith.constant 0 : i32
    return %arg0, %c0_i32, %c0_i32_0 : i32, i32, i32
  }
  func.func @transform_4(%arg0: i32) -> i32 {
    %c0_i32 = arith.constant 0 : i32
    %c0_i32_0 = arith.constant 0 : i32
    return %c0_i32 : i32
  }
}

</mosaic_0001>

<bundles_post_ra>
// kernel: tpu_custom_call.1
= control target key start
LH: loop header
LB: loop body
LE: loop exit
PB: predicated region body
PF: predicated region fallthrough
CT: control target
= control target key end

     0   :  { %9 = vsyncpa [#allocation4], 0  ;;  %s2074_s0 = inlined_call_operand.hbm [shape: f32[16,16], index: 0, kind: input, shape index: {}]   ;;  %s2075_s1 = inlined_call_operand.hbm [shape: f32[16,16], index: 1, kind: input, shape index: {}]   ;;  %s2076_s2 = inlined_call_operand.hbm [shape: f32[8,16,16], index: 2, kind: input, shape index: {}]   ;;  %s2077_s3 = inlined_call_operand.hbm [shape: f32[8,16,16], index: 3, kind: input, shape index: {}]   ;;  %s2078_s4 = inlined_call_operand.hbm [shape: f32[1], index: 4, kind: output, shape index: {}]  }
   0x1   :  { %10 = vsyncpa [#allocation7], 0 }
   0x2   :  { %11 = vsyncpa [#allocation5], 0  ;;  %s1773_s15 = smov 0   ;;  %s1775_s16 = smov 0  }
   0x3   :  { %s1777_s17 = smov 0   ;;  %s1779_s18 = smov 0  }
   0x4 LB: > { %s1792_s19 = sadd.s32 4294967295, %s1738_s18   ;;  %s1795_s20 = sadd.s32 1, %s1738_s18   ;;  %s1738_s18 = sphi %s1779_s18, %s2108_s18   ;;  %s1734_s17 = sphi %s1777_s17, %s2107_s17   ;;  %s1730_s16 = sphi %s1775_s16, %s2106_s16   ;;  %s1726_s15 = sphi %s1773_s15, %s2105_s15  }
   0x5   : > { %s63_s21 = ssub.s32 %s1738_s18, %s1795_s20  ;;  %s66_s22 = sadd.s32 1, %s1734_s17 }
   0x6   : > { %p64_p0 = scmp.eq.s32.totalorder %s63_s21, 0  ;;  %p73_p1 = scmp.ne.s32.totalorder %s1734_s17, %s1730_s16 }
   0x7   : > { %p74_p2 = scmp.eq.s32.totalorder %s1738_s18, 0  ;;  %p79_p3 = scmp.ne.s32.totalorder %s1730_s16, %s1726_s15 }
   0x8   : > { %s1805_s23 = scalar_select %p64_p0, %s1734_s17, %s66_s22  }
   0x9   : > { %p1807_p4 = por %p74_p2, %p73_p1  ;;  %p2079_p5 = scmp.eq.s32.totalorder %s1792_s19, 0 }
   0xa   : > { %p1278_p6 = scmp.ge.s32.totalorder %s1738_s18, 1  ;;  %p137_p7 = scmp.lt.s32.totalorder %s1738_s18, 9 }
   0xb   : > { %p1816_p8 = por %p2079_p5, %p79_p3  ;;  %s1740_s27 = smov [#allocation3]  }
   0xc   : > { %p1820_p9 = pnand %p1278_p6, %p137_p7  ;;  %s149_s28 = sshll.u32 %s1740_s27, 4  ;;  %s150_s28 = int_to_ptr.vmem [resolvable:$true] %s149_s28 }
   0xd   : > { %s2087_s25 = scalar_select %p1816_p8, 1, 0 }
   0xe   : > { %s2088_s26 = scalar_select %p1820_p9, 1, 0 }
   0xf   : > { %p1498_p10 = pneg %p1820_p9  ;;  %p1514_p12 = scmp.lt.s32.totalorder %s1738_s18, 8 }
  0x10   : > { %s176_s30 = sand.u32 1, %s1738_s18   ;;  %s178_s5 = sand.u32 1, %s1734_s17  }
  0x11   : > { %p1828_p11 = pnand %p1498_p10, %p2079_p5  ;;  %p1837_p13 = pnand %p1514_p12, %p1807_p4 }
  0x12   : > { %s1564_s9 = scalar_lea.hbm %s2074_s0, 256 }
  0x13   : > { %s2090_s6 = scalar_select %p1837_p13, 1, 0 }
  0x14   : > { %p1565_p0 = scmp.ne.s32.totalorder %s2074_s0, %s1564_s9  ;;  %p2083_p1 = pneg %p1828_p11 }
  0x15   : > { %p1571_p4 = scmp.lt.u32.totalorder %s1564_s9, %s2074_s0 }
  0x16   : > { %p1567_p2 = pnand %p2083_p1, %p1565_p0 }
  0x18   : > { %p1568_p3 = pneg %p1567_p2 }
  0x1a   : > { %p1573_p6 = pnand %p1571_p4, %p1568_p3 }
  0x1c   : > { %1576 = shalt.err (!%p1573_p6)
}
  0x1d   : > { %s1577_s14 = scalar_lea.vmem %s150_s28, 256  ;;  %p1585_p5 = scmp.lt.s32.totalorder %s150_s28, %s150_s28 }
  0x1e   : > { %p1578_p7 = scmp.ne.s32.totalorder %s150_s28, %s1577_s14  ;;  %p1586_p8 = scmp.lt.s32.totalorder %s1577_s14, %s1577_s14 }
  0x20   : > { %p1580_p10 = pnand %p1578_p7, %p2083_p1  ;;  %p1587_p9 = por %p1586_p8, %p1585_p5 }
  0x22   : > { %p1581_p12 = pneg %p1580_p10 }
  0x24   : > { %p1588_p13 = pnand %p1587_p9, %p1581_p12 }
  0x26   : > { %1591 = shalt.err (!%p1588_p13)
}
  0x27   : > { %s1741_s15 = smov 128   ;;  %s1742_s21 = smov 8  }
  0x28   : > { %1501 = dma.hbm_to_vmem [thread:$0]  (!%p1828_p11), %s2074_s0, 256, %s150_s28, [#allocation4], %s1741_s15, %s1741_s15, %s1742_s21  }
  0x29   : > { %s1866_s27 = sshll.u32 %s178_s5, 4  ;;  %s1321_s7 = sshll.u32 %s1738_s18, 8 }
  0x2a   : > { %s1874_s10 = scalar_lea.hbm %s2076_s2, %s1321_s7  ;;  %s180_s11 = scalar_lea.vmem [#allocation8], %s1866_s27 }
  0x2b   : > { %s187_s12 = sshll.u32 %s180_s11, 4  ;;  %s1743_s13 = smov [#allocation6]   ;;  %s1877_s12 = int_to_ptr.vmem [resolvable:$true] %s187_s12 }
  0x2c   : > { %s1879_s28 = sshll.u32 %s1743_s13, 4  ;;  %s1883_s5 = scalar_lea.sflag [#allocation4], %s176_s30  ;;  %s163_s28 = int_to_ptr.vmem [resolvable:$true] %s1879_s28 }
  0x2d   : > { %s1592_s14 = scalar_lea.hbm %s1874_s10, 256  ;;  %p2091_p8 = scmp.ne.s32.totalorder %s2090_s6, 0 }
  0x2e   : > { %p1593_p5 = scmp.ne.s32.totalorder %s1874_s10, %s1592_s14  ;;  %s1597_s8 = scalar_lea.hbm %s2076_s2, 2048 }
  0x2f   : > { %p2084_p9 = pneg %p2091_p8  ;;  %p1598_p2 = scmp.lt.u32.totalorder %s1874_s10, %s2076_s2 }
  0x30   : > { %p1599_p3 = scmp.lt.u32.totalorder %s1597_s8, %s1592_s14  ;;  %p1601_p6 = scmp.lt.u32.totalorder %s1592_s14, %s1874_s10 }
  0x31   : > { %p1595_p13 = pnand %p2084_p9, %p1593_p5 }
  0x32   : > { %p1600_p4 = por %p1599_p3, %p1598_p2 }
  0x33   : > { %p1596_p0 = pneg %p1595_p13 }
  0x34   : > { %p1602_p7 = por %p1601_p6, %p1600_p4 }
  0x36   : > { %p1603_p10 = pnand %p1602_p7, %p1596_p0 }
  0x38   : > { %1606 = shalt.err (!%p1603_p10)
}
  0x39   : > { %s1607_s30 = scalar_lea.vmem %s1877_s12, 256  ;;  %s1744_s13 = smov [#allocation8]  }
  0x3a   : > { %p1608_p12 = scmp.ne.s32.totalorder %s1877_s12, %s1607_s30  ;;  %s1612_s22 = sshll.u32 %s1744_s13, 4  ;;  %s1613_s22 = int_to_ptr.vmem [resolvable:$false] %s1612_s22 }
  0x3b   : > { %s1614_s24 = scalar_lea.vmem %s1613_s22, 512  ;;  %p1615_p1 = scmp.lt.s32.totalorder %s1877_s12, %s1613_s22 }
  0x3c   : > { %p1610_p5 = pnand %p1608_p12, %p2084_p9  ;;  %p1616_p2 = scmp.lt.s32.totalorder %s1614_s24, %s1607_s30 }
  0x3e   : > { %p1611_p13 = pneg %p1610_p5  ;;  %p1617_p3 = por %p1616_p2, %p1615_p1 }
  0x40   : > { %p1618_p4 = pnand %p1617_p3, %p1611_p13 }
  0x42   : > { %1621 = shalt.err (!%p1618_p4)
}
  0x43   : > { %1508 = dma.hbm_to_vmem [thread:$0]  (!%p2091_p8), %s1874_s10, 256, %s1877_s12, %s1883_s5, %s1741_s15, %s1741_s15, %s1742_s21  }
  0x44   : > { %s1622_s9 = scalar_lea.hbm %s2075_s1, 256  ;;  %p2092_p0 = pneg %p1828_p11 }
  0x45   : > { %p1623_p1 = scmp.ne.s32.totalorder %s2075_s1, %s1622_s9  ;;  %p1629_p10 = scmp.lt.u32.totalorder %s1622_s9, %s2075_s1 }
  0x47   : > { %p1625_p6 = pnand %p1623_p1, %p2092_p0 }
  0x49   : > { %p1626_p7 = pneg %p1625_p6 }
  0x4b   : > { %p1631_p12 = pnand %p1629_p10, %p1626_p7 }
  0x4d   : > { %1634 = shalt.err (!%p1631_p12)
}
  0x4e   : > { %s1635_s10 = scalar_lea.vmem %s163_s28, 256  ;;  %p2093_p13 = pmov %p2092_p0 }
  0x4f   : > { %p1636_p5 = scmp.ne.s32.totalorder %s163_s28, %s1635_s10  ;;  %p1643_p4 = scmp.lt.s32.totalorder %s163_s28, %s163_s28 }
  0x50   : > { %p1644_p9 = scmp.lt.s32.totalorder %s1635_s10, %s1635_s10 }
  0x51   : > { %p1638_p2 = pnand %p1636_p5, %p2093_p13 }
  0x52   : > { %p1645_p8 = por %p1644_p9, %p1643_p4 }
  0x53   : > { %p1639_p3 = pneg %p1638_p2 }
  0x55   : > { %p1646_p0 = pnand %p1645_p8, %p1639_p3 }
  0x57   : > { %1649 = shalt.err (!%p1646_p0)
}
  0x58   : > { %1504 = dma.hbm_to_vmem [thread:$0]  (!%p1828_p11), %s2075_s1, 256, %s163_s28, [#allocation7], %s1741_s15, %s1741_s15, %s1742_s21  }
  0x59   : > { %s1943_s9 = scalar_lea.hbm %s2077_s3, %s1321_s7  ;;  %s201_s29 = scalar_lea.vmem [#allocation9], %s1866_s27 }
  0x5a   : > { %s208_s11 = sshll.u32 %s201_s29, 4  ;;  %s1650_s30 = scalar_lea.hbm %s1943_s9, 256  ;;  %s1946_s11 = int_to_ptr.vmem [resolvable:$true] %s208_s11 }
  0x5b   : > { %p1651_p8 = scmp.ne.s32.totalorder %s1943_s9, %s1650_s30  ;;  %p2094_p9 = scmp.ne.s32.totalorder %s2090_s6, 0 }
  0x5c   : > { %s1655_s13 = scalar_lea.hbm %s2077_s3, 2048  ;;  %p1656_p7 = scmp.lt.u32.totalorder %s1943_s9, %s2077_s3 }
  0x5d   : > { %p2095_p1 = pneg %p2094_p9  ;;  %p1657_p10 = scmp.lt.u32.totalorder %s1655_s13, %s1650_s30 }
  0x5e   : > { %p1659_p5 = scmp.lt.u32.totalorder %s1650_s30, %s1943_s9 }
  0x5f   : > { %p1653_p6 = pnand %p1651_p8, %p2095_p1  ;;  %p1658_p12 = por %p1657_p10, %p1656_p7 }
  0x61   : > { %p1654_p11 = pneg %p1653_p6  ;;  %p1660_p13 = por %p1659_p5, %p1658_p12 }
  0x63   : > { %p1661_p2 = pnand %p1660_p13, %p1654_p11 }
  0x65   : > { %1664 = shalt.err (!%p1661_p2)
}
  0x66   : > { %s1665_s27 = scalar_lea.vmem %s1946_s11, 256  ;;  %p2096_p4 = pmov %p2095_p1 }
  0x67   : > { %p1666_p3 = scmp.ne.s32.totalorder %s1946_s11, %s1665_s27  ;;  %s1745_s10 = smov [#allocation9]  }
  0x68   : > { %s1670_s12 = sshll.u32 %s1745_s10, 4  ;;  %s1671_s12 = int_to_ptr.vmem [resolvable:$false] %s1670_s12 }
  0x69   : > { %p1668_p0 = pnand %p1666_p3, %p2096_p4  ;;  %s1672_s24 = scalar_lea.vmem %s1671_s12, 512 }
  0x6a   : > { %p1673_p1 = scmp.lt.s32.totalorder %s1946_s11, %s1671_s12  ;;  %p1674_p6 = scmp.lt.s32.totalorder %s1672_s24, %s1665_s27 }
  0x6b   : > { %p1669_p8 = pneg %p1668_p0 }
  0x6c   : > { %p1675_p7 = por %p1674_p6, %p1673_p1 }
  0x6e   : > { %p1676_p10 = pnand %p1675_p7, %p1669_p8 }
  0x70   : > { %1679 = shalt.err (!%p1676_p10)
}
  0x71   : > { %1511 = dma.hbm_to_vmem [thread:$0]  (!%p2094_p9), %s1943_s9, 256, %s1946_s11, %s1883_s5, %s1741_s15, %s1741_s15, %s1742_s21  }
  0x72   : > { %p2097_p11 = scmp.ne.s32.totalorder %s2088_s26, 0 }
  0x73   : > { %p2098_p12 = scmp.eq.s32.totalorder (!%p2097_p11), %s1792_s19, 0 }
  0x74   : > { %220 = sbr.rel (%p2097_p11) target bundleno = 844 (0x34c), region = 36 }
  0x7b   : > { %1709 = dma.done.wait (%p2098_p12), [#allocation4], 256   ;;  %p2099_p5 = pmov %p2098_p12 }
  0x7d   : > { %1711 = vsyncadd (%p2099_p5), [#allocation4], 4294967040  ;;  %p2100_p13 = pmov %p2099_p5 }
  0x7e   : > { %p2101_p2 = pmov %p2099_p5 }
  0x7f   : > { %1713 = dma.done.wait (%p2100_p13), [#allocation7], 256  }
  0x80   : > { %1715 = vsyncadd (%p2101_p2), [#allocation7], 4294967040  ;;  %s230_s6 = sand.u32 1, %s1792_s19   ;;  %s232_s15 = sand.u32 1, %s1730_s16  }
  0x81   : > { %s1291_s21 = sshll.u32 %s232_s15, 4  ;;  %s231_s26 = scalar_lea.sflag [#allocation4], %s230_s6 }
  0x82   : > { %s234_s5 = scalar_lea.vmem [#allocation8], %s1291_s21  ;;  %p2102_p9 = scmp.ne.s32.totalorder %s2087_s25, 0 }
  0x84   : > { %1717 = dma.done.wait (%p2102_p9), %s231_s26, 512  }
  0x85   : > { %1719 = vsyncadd (%p2102_p9), %s231_s26, 4294966784  ;;  %vm289_vm0 = vcmask 130048   ;;  %v1991_v0 = vld [vmem:[%s234_s5] sm:$0xff]  ;;  %v1993_v1 = vld [vmem:[%s234_s5 + $0x8] sm:$0xff]  ;;  %s243_s14 = scalar_lea.vmem [#allocation9], %s1291_s21  ;;  %s1746_s25 = smov 0.0  }
  0x86   : > { %v280_v2 = vld [vmem:[#allocation3] sm:$0xff]  ;;  %v1433_v3 = vpack.c.bf16 %v1993_v1, %v1991_v0  ;;  %v2000_v5 = vld [vmem:[%s243_s14 + $0x8] sm:$0xff]  ;;  %v629_v6 = vmul.f32 %v1991_v0, %v1991_v0  ;;  %v630_v7 = vmul.f32 %v1993_v1, %v1993_v1  ;;  %v282_v9 = vld [vmem:[#allocation6] sm:$0xff]  ;;  %p2103_p3 = pmov %p2101_p2  ;;  %p2104_p4 = pmov %p2101_p2 }
  0x87   : > { %1367 = vmatprep.mubr.msk.f32.mxu0 %vm289_vm0, %v280_v2  ;;  %v1998_v4 = vld [vmem:[%s243_s14] sm:$0xff]  ;;  %v283_v10 = vld [vmem:[#allocation6 + $0x8] sm:$0xff]  ;;  %v281_v12 = vld [vmem:[#allocation3 + $0x8] sm:$0xff]  ;;  %v790_v15 = vmul.f32 %v2000_v5, %v2000_v5  ;;  %v950_v18 = vmul.f32 %v2000_v5, %v1993_v1  ;;  %v285_v31 = vsub.f32 %v1993_v1, %v2000_v5  ;;  %p1315_p0 = scmp.ne.s32.totalorder %s1792_s19, 7 }
  0x88   : > { %v1441_v8 = vpack.c.bf16 %v2000_v5, %v1998_v4  ;;  %1434 = vmatprep.subr.bf16.mxu0 %v1433_v3  ;;  %v1437_v11 = vpack.c.bf16 %v283_v10, %v282_v9  ;;  %v1449_v13 = vpack.c.bf16 %v630_v7, %v629_v6  ;;  %v789_v14 = vmul.f32 %v1998_v4, %v1998_v4  ;;  %1492 = sst [smem:[#allocation2]] (%p2103_p3), %s1746_s25 }
  0x89   : > { %1436 = vmatpush3.bf16.msra.mxu0 %v1433_v3  ;;  %v949_v17 = vmul.f32 %v1998_v4, %v1991_v0  ;;  %v284_v30 = vsub.f32 %v1991_v0, %v1998_v4  ;;  %v288_v33 = vmul.f32 %v285_v31, %v285_v31  ;;  %1493 = sst [smem:[#allocation2 + $0x1]] (%p2104_p4), %s1746_s25  ;;  %s286_s8 = sld [smem:[#allocation2]] }
  0x8a   : > { %1442 = vmatprep.subr.bf16.mxu0 %v1441_v8  ;;  %1438 = vmatprep.subr.bf16.mxu1 %v1437_v11  ;;  %v1457_v16 = vpack.c.bf16 %v790_v15, %v789_v14  ;;  %s1314_s11 = sld [smem:[#allocation2 + $0x1]] }
  0x8b   : > { %1440 = vmatpush3.bf16.msra.mxu1 %v1437_v11  ;;  %v1465_v19 = vpack.c.bf16 %v950_v18, %v949_v17  ;;  %v287_v32 = vmul.f32 %v284_v30, %v284_v30  ;;  %v291_v35 = vsel %vm289_vm0, %v288_v33, 0.0 }
  0x8c   : > { %1368 = vmatmul.mubr.msk.f32.vlgmr.msra.gmra.mrb[0].mxu0 %vm289_vm0, %v281_v12  ;;  %1446 = vmatprep.subr.bf16.mxu1 %v1437_v11 }
  0x8d   : > { %1444 = vmatpush3.bf16.msra.mxu0 %v1441_v8  ;;  %1381 = vmatprep.mubr.msk.f32.mxu0 %vm289_vm0, %v280_v2  ;;  %v290_v34 = vsel %vm289_vm0, %v287_v32, 0.0 }
  0x8e   : > { %1450 = vmatprep.subr.bf16.mxu0 %v1449_v13  ;;  %v292_v36 = vadd.f32 %v291_v35, %v290_v34 }
  0x90   : > { %1382 = vmatmul.mubr.msk.f32.vlgmr.msra.gmra.mrb[2].mxu0 %vm289_vm0, %v281_v12  ;;  %293 = vadd.xlane.f32.xlu0 %v292_v36 }
  0x91   : > { %1452 = vmatpush3.bf16.msra.mxu0 %v1449_v13  ;;  %1395 = vmatprep.mubr.msk.f32.mxu0 %vm289_vm0, %v280_v2 }
  0x92   : > { %1458 = vmatprep.subr.bf16.mxu0 %v1457_v16 }
  0x94   : > { %1396 = vmatmul.mubr.msk.f32.vlgmr.msra.gmra.mrb[4].mxu0 %vm289_vm0, %v281_v12 }
  0x95   : > { %1460 = vmatpush3.bf16.msra.mxu0 %v1457_v16  ;;  %1409 = vmatprep.mubr.msk.f32.mxu0 %vm289_vm0, %v280_v2 }
  0x96   : > { %1466 = vmatprep.subr.bf16.mxu0 %v1465_v19 }
  0x98   : > { %1410 = vmatmul.mubr.msk.f32.vlgmr.msra.gmra.mrb[6].mxu0 %vm289_vm0, %v281_v12 }
  0x99   : > { %1468 = vmatpush3.bf16.msra.mxu0 %v1465_v19  ;;  %1423 = vmatprep.mubr.msk.f32.mxu0 %vm289_vm0, %v280_v2 }
  0x9c   : > { %1424 = vmatmul.mubr.msk.f32.vlgmr.msra.gmra.mrb[8].mxu0 %vm289_vm0, %v281_v12 }
 0x15f   : > { %v1369_v20 = vpop.f32.mrb[0].mxu0 }
 0x160   : > { %v377_v21 = vpop.f32.mrb[1].mxu0 }
 0x161   : > { %1374 = vmatprep.mubr.msk.f32.mxu1 %vm289_vm0, %v377_v21 }
 0x162   : > { %1375 = vmatmul.mubr.msk.f32.vlgmr.msra.gmra.mrb[0].mxu1 %vm289_vm0, %v1369_v20 }
 0x163   : > { %v1383_v22 = vpop.f32.mrb[2].mxu0  ;;  %1448 = vmatpush3.bf16.msra.mxu1 %v1437_v11 }
 0x164   : > { %v533_v23 = vpop.f32.mrb[3].mxu0  ;;  %1454 = vmatprep.subr.bf16.mxu1 %v1437_v11 }
 0x165   : > { %1388 = vmatprep.mubr.msk.f32.mxu1 %vm289_vm0, %v533_v23 }
 0x166   : > { %1389 = vmatmul.mubr.msk.f32.vlgmr.msra.gmra.mrb[2].mxu1 %vm289_vm0, %v1383_v22 }
 0x167   : > { %v1397_v24 = vpop.f32.mrb[4].mxu0  ;;  %1456 = vmatpush3.bf16.msra.mxu1 %v1437_v11 }
 0x168   : > { %v697_v25 = vpop.f32.mrb[5].mxu0  ;;  %1462 = vmatprep.subr.bf16.mxu1 %v1437_v11 }
 0x169   : > { %1402 = vmatprep.mubr.msk.f32.mxu1 %vm289_vm0, %v697_v25 }
 0x16a   : > { %1403 = vmatmul.mubr.msk.f32.vlgmr.msra.gmra.mrb[4].mxu1 %vm289_vm0, %v1397_v24 }
 0x16b   : > { %v1411_v26 = vpop.f32.mrb[6].mxu0  ;;  %1464 = vmatpush3.bf16.msra.mxu1 %v1437_v11 }
 0x16c   : > { %v857_v27 = vpop.f32.mrb[7].mxu0  ;;  %1470 = vmatprep.subr.bf16.mxu1 %v1437_v11 }
 0x16d   : > { %1416 = vmatprep.mubr.msk.f32.mxu1 %vm289_vm0, %v857_v27 }
 0x16e   : > { %1417 = vmatmul.mubr.msk.f32.vlgmr.msra.gmra.mrb[6].mxu1 %vm289_vm0, %v1411_v26 }
 0x16f   : > { %v1425_v28 = vpop.f32.mrb[8].mxu0  ;;  %1472 = vmatpush3.bf16.msra.mxu1 %v1437_v11 }
 0x170   : > { %v1017_v29 = vpop.f32.mrb[9].mxu0 }
 0x171   : > { %1430 = vmatprep.mubr.msk.f32.mxu1 %vm289_vm0, %v1017_v29 }
 0x172   : > { %1431 = vmatmul.mubr.msk.f32.vlgmr.msra.gmra.mrb[8].mxu1 %vm289_vm0, %v1425_v28  ;;  %v294_v28 = vpop.xlane.xlu0 %293 }
 0x173   : > { %v295_v29 = vrot.slane %v294_v28, 4 }
 0x175   : > { %v296_v30 = vadd.f32 %v295_v29, %v294_v28 }
 0x177   : > { %v297_v31 = vrot.slane %v296_v30, 2 }
 0x179   : > { %v298_v32 = vadd.f32 %v297_v31, %v296_v30 }
 0x17b   : > { %v299_v33 = vrot.slane %v298_v32, 1 }
 0x17d   : > { %v300_v34 = vadd.f32 %v299_v33, %v298_v32 }
 0x17f   : > { %1473 = vpush %v300_v34 }
 0x1b0   : > { %s1474_s9 = spop %1473 }
 0x1b1   : > { %s302_s29 = sadd.f32 %s1474_s9, %s286_s8 }
 0x1b3   : > { %304 = sst [smem:[#allocation2]] %s302_s29 }
 0x1b4   : > { %s1159_s28 = sld [smem:[#allocation2]] (!%p1315_p0) }
 0x1ba   : > { %s1162_s13 = smul.f32 (!%p1315_p0), 0.00048828125, %s1159_s28 }
 0x1bc   : > { %s1163_s7 = sadd.f32 (!%p1315_p0), 1e-06, %s1162_s13 }
 0x235   : > { %v1376_v37 = vpop.f32.mrb[0].mxu1 }
 0x236   : > { %v458_v38 = vpop.f32.mrb[1].mxu1  ;;  %v624_v40 = vmul.f32 %v1376_v37, %v1376_v37 }
 0x237   : > { %v623_v44 = vmul.f32 %v458_v38, %v458_v38 }
 0x239   : > { %v1390_v39 = vpop.f32.mrb[2].mxu1 }
 0x23a   : > { %v626_v41 = vmul.f32 %v1390_v39, %v1390_v39  ;;  %v628_v42 = vmul.f32 %v1390_v39, %v1376_v37  ;;  %v614_v43 = vpop.f32.mrb[3].mxu1 }
 0x23b   : > { %v625_v45 = vmul.f32 %v614_v43, %v614_v43  ;;  %v627_v46 = vmul.f32 %v614_v43, %v458_v38 }
 0x23c   : > { %v1120_v47 = vadd.f32 %v626_v41, %v624_v40  ;;  %v1110_v60 = vmul.f32 2.0, %v628_v42 }
 0x23d   : > { %v1119_v48 = vadd.f32 %v625_v45, %v623_v44  ;;  %v1404_v49 = vpop.f32.mrb[4].mxu1  ;;  %v1109_v1 = vmul.f32 2.0, %v627_v46 }
 0x23e   : > { %v788_v50 = vsub.f32 %v1404_v49, %v624_v40  ;;  %v778_v51 = vpop.f32.mrb[5].mxu1  ;;  %v1122_v61 = vadd.f32 0.0001, %v1120_v47  ;;  %v1112_v9 = vadd.f32 0.0001, %v1110_v60 }
 0x23f   : > { %v787_v52 = vsub.f32 %v778_v51, %v623_v44  ;;  %v1121_v2 = vadd.f32 0.0001, %v1119_v48  ;;  %v1111_v12 = vadd.f32 0.0001, %v1109_v1 }
 0x241   : > { %v1418_v53 = vpop.f32.mrb[6].mxu1 }
 0x242   : > { %v948_v54 = vsub.f32 %v1418_v53, %v626_v41  ;;  %v938_v55 = vpop.f32.mrb[7].mxu1 }
 0x243   : > { %v947_v56 = vsub.f32 %v938_v55, %v625_v45 }
 0x244   : > { %v1124_v57 = vadd.f32 %v948_v54, %v788_v50 }
 0x245   : > { %v1123_v58 = vadd.f32 %v947_v56, %v787_v52  ;;  %v1432_v59 = vpop.f32.mrb[8].mxu1 }
 0x246   : > { %v1126_v62 = vadd.f32 0.0009, %v1124_v57  ;;  %v1108_v63 = vsub.f32 %v1432_v59, %v628_v42  ;;  %v1098_v0 = vpop.f32.mrb[9].mxu1  ;;  %v1164_v42 = vstv (!%p1315_p0), %s1163_s7 }
 0x247   : > { %v1125_v3 = vadd.f32 0.0009, %v1123_v58  ;;  %v1107_v4 = vsub.f32 %v1098_v0, %v627_v46  ;;  %vm1167_vm1 = vcmp.eq.f32.partialorder (!%p1315_p0), %v1164_v42, inf  ;;  %v1170_v44 = vand.u32 (!%p1315_p0), 2147483648, %v1164_v42 }
 0x248   : > { %v1128_v5 = vmul.f32 %v1126_v62, %v1122_v61  ;;  %v1114_v6 = vmul.f32 2.0, %v1108_v63  ;;  %vm1169_vm2 = vcmp.eq.f32.partialorder (!%p1315_p0), %v1164_v42, 0.0 }
 0x249   : > { %v1127_v7 = vmul.f32 %v1125_v3, %v1121_v2  ;;  %v1113_v8 = vmul.f32 2.0, %v1107_v4 }
 0x24a   : > { %v1130_v10 = vadd.f32 1e-12, %v1128_v5  ;;  %v1116_v11 = vadd.f32 0.0009, %v1114_v6 }
 0x24b   : > { %v1129_v13 = vadd.f32 1e-12, %v1127_v7  ;;  %v1115_v14 = vadd.f32 0.0009, %v1113_v8 }
 0x24c   : > { %1558 = vrcp.f32 %v1130_v10  ;;  %v1118_v15 = vmul.f32 %v1116_v11, %v1112_v9 }
 0x24d   : > { %1560 = vrcp.f32 %v1129_v13  ;;  %v1117_v16 = vmul.f32 %v1115_v14, %v1111_v12 }
 0x24e   : > { %1562 = vrsqrt.f32 (!%p1315_p0), %v1164_v42 }
 0x256   : > { %v1559_v17 = vpop.eup %1558 }
 0x257   : > { %v1561_v18 = vpop.eup %1560  ;;  %v1134_v19 = vmul.f32 %v1559_v17, %v1118_v15 }
 0x258   : > { %v1133_v20 = vmul.f32 %v1561_v18, %v1117_v16  ;;  %v1563_v43 = vpop.eup (!%p1315_p0), %1562 }
 0x259   : > { %v1137_v21 = vsub.f32 1.0, %v1134_v19  ;;  %v1166_v45 = vmul.f32 (!%p1315_p0), %v1563_v43, %v1164_v42 }
 0x25a   : > { %v1136_v22 = vsub.f32 1.0, %v1133_v20 }
 0x25b   : > { %v1139_v23 = vmul.f32 0.5, %v1137_v21  ;;  %v1168_v46 = vsel (!%p1315_p0), %vm1167_vm1, %v1164_v42, %v1166_v45 }
 0x25c   : > { %v1138_v24 = vmul.f32 0.5, %v1136_v22  ;;  %v1171_v47 = vsel (!%p1315_p0), %vm1169_vm2, %v1170_v44, %v1168_v46 }
 0x25d   : > { %v1141_v25 = vsel %vm289_vm0, %v1139_v23, 0.0 }
 0x25e   : > { %v1140_v26 = vsel %vm289_vm0, %v1138_v24, 0.0 }
 0x25f   : > { %v1142_v27 = vadd.f32 %v1141_v25, %v1140_v26 }
 0x261   : > { %1143 = vadd.xlane.f32.xlu0 %v1142_v27 }
 0x2ee   : > { %v1144_v35 = vpop.xlane.xlu0 %1143 }
 0x2ef   : > { %v1145_v36 = vrot.slane %v1144_v35, 4 }
 0x2f1   : > { %v1146_v37 = vadd.f32 %v1145_v36, %v1144_v35 }
 0x2f3   : > { %v1147_v38 = vrot.slane %v1146_v37, 2 }
 0x2f5   : > { %v1148_v39 = vadd.f32 %v1147_v38, %v1146_v37 }
 0x2f7   : > { %v1149_v40 = vrot.slane %v1148_v39, 1 }
 0x2f9   : > { %v1150_v41 = vadd.f32 %v1149_v40, %v1148_v39 }
 0x2fb   : > { %1475 = vpush %v1150_v41 }
 0x2fc   : > { %1477 = vpush (!%p1315_p0), %v1171_v47 }
 0x329   : > { %1158 = sbr.rel (%p1315_p0) target bundleno = 829 (0x33d), region = 60 }
 0x32c   : > { %s1476_s30 = spop %1475 }
 0x32d   : > { %s1152_s18 = sadd.f32 %s1476_s30, %s1314_s11  ;;  %s1478_s12 = spop (!%p1315_p0), %1477 }
 0x32e   : > { %s1177_s24 = smul.f32 (!%p1315_p0), 0.8, %s1478_s12 }
 0x32f   : > { %1154 = sst [smem:[#allocation2 + $0x1]] %s1152_s18 }
 0x330   : > { %s1316_s22 = sld [smem:[#allocation2 + $0x1]] }
 0x336   : > { %s1176_s27 = smul.f32 0.00048828125, %s1316_s22 }
 0x338   : > { %s1178_s10 = smul.f32 0.2, %s1176_s27 }
 0x33a   : > { %s1179_s6 = sadd.f32 %s1178_s10, %s1177_s24 }
 0x33c   : > { %1181 = sst [smem:[#allocation10]] %s1179_s6 }
 0x33d PF: > { %p1518_p8 = scmp.eq.s32.totalorder %s1792_s19, 7  ;;  %s1680_s26 = scalar_lea.hbm %s2078_s4, 16 }
 0x33e   : > { %p1681_p1 = scmp.ne.s32.totalorder %s2078_s4, %s1680_s26  ;;  %p1686_p10 = scmp.lt.u32.totalorder %s1680_s26, %s2078_s4 }
 0x340   : > { %p1682_p6 = pnand %p1681_p1, %p1518_p8 }
 0x342   : > { %p1683_p7 = pneg %p1682_p6 }
 0x344   : > { %p1688_p11 = pnand %p1686_p10, %p1683_p7 }
 0x346   : > { %1691 = shalt.err (!%p1688_p11)
}
 0x347   : > { %s1747_s9 = smov [#allocation10]  }
 0x348   : > { %1495 = dma.smem_to_hbm (%p1518_p8), %s1747_s9, 16, %s2078_s4, [#allocation5]  }
 0x349   : > { %1721 = dma.done.wait (%p1518_p8), [#allocation5], 16  }
 0x34a   : > { %1723 = vsyncadd (%p1518_p8), [#allocation5], 4294967280 }
 0x34b   : > { %1195 = sfence }
 0x34c PF: > { %p14_p12 = scmp.ge.s32.totalorder %s1795_s20, 10   ;;  %s2105_s15 = smov %s1730_s16 }
 0x34d   : > { %s2106_s16 = smov %s1734_s17  ;;  %s2107_s17 = smov %s1805_s23 }
 0x34e   : > { %s2108_s18 = smov %s1795_s20  ;;  %16 = sbr.rel (!%p14_p12) target bundleno = 4 (0x4), region = 104 }
 0x355   :  { %1201 = vsyncpa [#allocation4], 1 }
 0x356   :  { %1203 = vsyncpa [#allocation4 + $0x1], 1 }
 0x357   :  { %1204 = vsyncpa [#allocation7], 1 }
 0x358   :  { %1205 = vsyncpa [#allocation5], 1 }
 0x359   :  { %1207 = vsyncpa [#allocation5 + $0x1], 1 }

</bundles_post_ra>
